<compile_context>
chip_gen: v5e
topology: v5e:2x2
jax: 0.10.0
libtpu: 0.0.40
codegen_flags: <defaults>
</compile_context>

<pallas_src>
import functools

import jax
import jax.numpy as jnp
from jax.experimental import pallas as pl
from jax.experimental.pallas import tpu as pltpu

_EPS = 1e-12  # F.normalize default eps


def _round_up(n, m):
    return ((n + m - 1) // m) * m


def _memory_bank_kernel(x_ref, mem_ref, o_ref, *, inv_sigma, m_valid, matmul_dtype):
    # x_ref:   (TB, Dp)  batch tile (f32)
    # mem_ref: (Mp, Dp)  full memory bank (bf16), single-buffered in VMEM
    # o_ref:   (TB, Mp)  output tile
    x = x_ref[...].astype(jnp.float32)

    # L2 normalize rows of x in f32 on the VPU: x / max(||x||_2, eps).
    sq = jnp.sum(x * x, axis=1, keepdims=True)
    x_n = x / jnp.maximum(jnp.sqrt(sq), _EPS)

    # similarities = x_n @ memory.T on the MXU, bf16 inputs / f32 accumulation.
    sim = jax.lax.dot_general(
        x_n.astype(matmul_dtype),
        mem_ref[...].astype(matmul_dtype),
        dimension_numbers=(((1,), (1,)), ((), ())),
        preferred_element_type=jnp.float32,
    )

    # exp(sim / sigma) in stable form: subtract the per-row max (it cancels
    # exactly in the L1 normalization), multiply by the static 1/sigma.
    s = sim * inv_sigma
    s_max = jnp.max(s, axis=1, keepdims=True)
    k = jnp.exp(s - s_max)

    # Zero out padded memory columns so they don't contribute to the L1 sum.
    if m_valid != k.shape[1]:
        col = jax.lax.broadcasted_iota(jnp.int32, k.shape, 1)
        k = jnp.where(col < m_valid, k, 0.0)

    denom = jnp.maximum(jnp.sum(k, axis=1, keepdims=True), _EPS)
    o_ref[...] = (k * pl.reciprocal(denom, approx=True)).astype(o_ref.dtype)


def memory_bank_mapper_forward(
    x,
    memory,
    *,
    sigma=1.0,
    tile_b=128,
    matmul_dtype=jnp.bfloat16,
    out_dtype=jnp.float32,
):
    """Pallas implementation of MemoryBankMapper.forward.

    x:      (B, feature_dim) float
    memory: (memory_size, feature_dim) float (rows assumed L2-normalized)
    returns (B, memory_size) `out_dtype`
    """
    B, D = x.shape
    M, D2 = memory.shape
    assert D == D2, "feature dims must match"

    # Lane/sublane-dense padding: contraction dim and memory dim to multiples
    # of 128, batch tile to a multiple of 8 (clamped for small batches).
    D_pad = _round_up(D, 128)
    M_pad = _round_up(M, 128)
    tile_b = _round_up(max(8, min(int(tile_b), _round_up(B, 8))), 8)
    B_pad = _round_up(B, tile_b)
    # For realistic workloads keep B_pad // tile_b >= ~8 so the pipeline stays
    # full on both v7x TensorCores when the batch axis is "parallel".

    x_p = x.astype(jnp.float32)
    if (B_pad, D_pad) != (B, D):
        x_p = jnp.pad(x_p, ((0, B_pad - B), (0, D_pad - D)))
    mem_p = memory.astype(matmul_dtype)  # bf16 bank: half the DMA and VMEM.
    if (M_pad, D_pad) != (M, D):
        mem_p = jnp.pad(mem_p, ((0, M_pad - M), (0, D_pad - D)))

    kernel = functools.partial(
        _memory_bank_kernel,
        inv_sigma=float(1.0 / float(sigma)),
        m_valid=M,
        matmul_dtype=matmul_dtype,
    )

    # VMEM budget: bank x1 (single-buffered) + 2x x tile + 2x out tile.
    bank_bytes = M_pad * D_pad * jnp.dtype(matmul_dtype).itemsize
    x_bytes = 2 * tile_b * D_pad * 4
    out_bytes = 2 * tile_b * M_pad * jnp.dtype(out_dtype).itemsize
    need = bank_bytes + x_bytes + out_bytes
    vmem_limit = int(min(max(32 << 20, 2 * need + (4 << 20)), 64 << 20))
    # TODO(synk): for banks larger than ~half of per-TC VMEM (v7x: 64 MiB total),
    # add a second ("arbitrary") grid axis over M with an online running
    # denominator + finalize pass instead of keeping the full bank resident.

    out = pl.pallas_call(
        kernel,
        out_shape=jax.ShapeDtypeStruct((B_pad, M_pad), out_dtype),
        grid_spec=pltpu.PrefetchScalarGridSpec(
            num_scalar_prefetch=0,
            grid=(B_pad // tile_b,),
            in_specs=[
                # x batch tile (double-buffered by default).
                pl.BlockSpec((tile_b, D_pad), lambda i: (i, 0)),
                # Full memory bank; block index is constant across the grid, so
                # single-buffer it to halve its VMEM footprint.
                pl.BlockSpec(
                    (M_pad, D_pad),
                    lambda i: (0, 0),
                    pipeline_mode=pl.Buffered(1),
                ),
            ],
            out_specs=pl.BlockSpec((tile_b, M_pad), lambda i: (i, 0)),
        ),
        compiler_params=pltpu.CompilerParams(
            dimension_semantics=("parallel",),
            vmem_limit_bytes=vmem_limit,
        ),
    )(x_p, mem_p)

    if (B_pad, M_pad) != (B, M):
        out = out[:B, :M]
    return out


def _reference_forward(x, memory, sigma=1.0):
    """Pure-JAX f32 reference matching the PyTorch forward."""
    norm = jnp.linalg.norm(x, axis=1, keepdims=True)
    x_n = x / jnp.maximum(norm, _EPS)
    sim = x_n @ memory.T
    k = jnp.exp(sim / sigma)
    return k / jnp.maximum(jnp.sum(k, axis=1, keepdims=True), _EPS)


if __name__ == "__main__":
    key = jax.random.PRNGKey(0)
    k_mem, k_x = jax.random.split(key)

    feature_dim = 128
    memory_size = 200   # not a multiple of 128 -> exercises M padding + mask
    batch = 12          # not a multiple of 8   -> exercises batch padding
    sigma = 1.0

    # Deterministic "buffer" init, mirroring __init__:
    # memory = normalize(randn(memory_size, feature_dim), dim=1)
    memory = jax.random.normal(k_mem, (memory_size, feature_dim), jnp.float32)
    memory = memory / jnp.maximum(
        jnp.linalg.norm(memory, axis=1, keepdims=True), _EPS
    )
    x = jax.random.normal(k_x, (batch, feature_dim), jnp.float32)

    out = memory_bank_mapper_forward(x, memory, sigma=sigma, tile_b=128)
    out = jax.block_until_ready(out)

    ref = _reference_forward(x, memory, sigma=sigma)
    assert out.shape == (batch, memory_size)
    # bf16 MXU inputs + approx reciprocal -> relaxed tolerance vs f32 reference.
    assert jnp.allclose(out, ref, rtol=2e-2, atol=1e-4), "mismatch vs reference"
    # rows of kernel_weights sum to ~1 (L1 normalized).
    assert jnp.allclose(jnp.sum(out, axis=1), 1.0, atol=1e-2)

    # TODO(synk): `update()` (in-place ring-buffer memory write with pointer)
    # is training-time state mutation, not part of forward; left unimplemented.

    print("KERNEL_OK")
</pallas_src>

<mosaic_0001>
module attributes {stable_mosaic.version = 11 : i64} {
  func.func @_memory_bank_kernel(%arg0: i32, %arg1: memref<16x128xf32, #tpu.memory_space<vmem>>, %arg2: memref<256x128xbf16, #tpu.memory_space<vmem>>, %arg3: memref<16x256xf32, #tpu.memory_space<vmem>>) attributes {dimension_semantics = [#tpu.dimension_semantics<parallel>], iteration_bounds = array<i64: 1>, scalar_prefetch = 0 : i64, scratch_operands = 0 : i64, tpu.core_type = #tpu.core_type<tc>, window_params = [{transform_indices = @transform_0, window_bounds = array<i64: 16, 128>}, {pipeline_mode = #tpu.pipeline_mode<synchronous>, transform_indices = @transform_1, window_bounds = array<i64: 256, 128>}, {transform_indices = @transform_2, window_bounds = array<i64: 16, 256>}]} {
    %c0 = arith.constant 0 : index
    %c0_0 = arith.constant 0 : index
    %0 = vector.load %arg1[%c0, %c0_0] : memref<16x128xf32, #tpu.memory_space<vmem>>, vector<16x128xf32>
    %1 = arith.mulf %0, %0 : vector<16x128xf32>
    %cst = arith.constant dense<0.000000e+00> : vector<16xf32>
    %2 = vector.multi_reduction <add>, %1, %cst [1] : vector<16x128xf32> to vector<16xf32>
    %3 = vector.shape_cast %2 : vector<16xf32> to vector<16x1xf32>
    %4 = math.sqrt %3 : vector<16x1xf32>
    %cst_1 = arith.constant 9.99999996E-13 : f32
    %5 = vector.broadcast %cst_1 : f32 to vector<16x1xf32>
    %6 = arith.maximumf %4, %5 : vector<16x1xf32>
    %7 = vector.broadcast %6 : vector<16x1xf32> to vector<16x128xf32>
    %8 = arith.divf %0, %7 : vector<16x128xf32>
    %9 = arith.truncf %8 : vector<16x128xf32> to vector<16x128xbf16>
    %c0_2 = arith.constant 0 : index
    %c0_3 = arith.constant 0 : index
    %10 = vector.load %arg2[%c0_2, %c0_3] : memref<256x128xbf16, #tpu.memory_space<vmem>>, vector<256x128xbf16>
    %cst_4 = arith.constant dense<0.000000e+00> : vector<16x256xf32>
    %11 = tpu.matmul %9, %10, %cst_4 {dimension_numbers = #tpu.dot_dimension_numbers<[1], [1], [0], [0], [0, 0, 1, 0], [], []>} : vector<16x128xbf16>, vector<256x128xbf16>, vector<16x256xf32> -> vector<16x256xf32>
    %cst_5 = arith.constant 1.000000e+00 : f32
    %12 = vector.broadcast %cst_5 : f32 to vector<16x256xf32>
    %13 = arith.mulf %11, %12 : vector<16x256xf32>
    %cst_6 = arith.constant dense<0xFF800000> : vector<16xf32>
    %14 = vector.multi_reduction <maximumf>, %13, %cst_6 [1] : vector<16x256xf32> to vector<16xf32>
    %15 = vector.shape_cast %14 : vector<16xf32> to vector<16x1xf32>
    %16 = vector.broadcast %15 : vector<16x1xf32> to vector<16x256xf32>
    %17 = arith.subf %13, %16 : vector<16x256xf32>
    %18 = math.exp %17 : vector<16x256xf32>
    %19 = tpu.iota {dimensions = array<i32: 1>} : vector<16x256xi32>
    %c200_i32 = arith.constant 200 : i32
    %20 = vector.broadcast %c200_i32 : i32 to vector<16x256xi32>
    %21 = arith.cmpi slt, %19, %20 : vector<16x256xi32>
    %cst_7 = arith.constant 0.000000e+00 : f32
    %22 = vector.broadcast %cst_7 : f32 to vector<16x256xf32>
    %23 = arith.select %21, %18, %22 : vector<16x256xi1>, vector<16x256xf32>
    %cst_8 = arith.constant dense<0.000000e+00> : vector<16xf32>
    %24 = vector.multi_reduction <add>, %23, %cst_8 [1] : vector<16x256xf32> to vector<16xf32>
    %25 = vector.shape_cast %24 : vector<16xf32> to vector<16x1xf32>
    %cst_9 = arith.constant 9.99999996E-13 : f32
    %26 = vector.broadcast %cst_9 : f32 to vector<16x1xf32>
    %27 = arith.maximumf %25, %26 : vector<16x1xf32>
    %28 = tpu.reciprocal %27 {approx = true} : vector<16x1xf32> -> vector<16x1xf32>
    %29 = vector.broadcast %28 : vector<16x1xf32> to vector<16x256xf32>
    %30 = arith.mulf %23, %29 : vector<16x256xf32>
    %c0_10 = arith.constant 0 : index
    %c0_11 = arith.constant 0 : index
    %31 = vector.load %arg3[%c0_10, %c0_11] : memref<16x256xf32, #tpu.memory_space<vmem>>, vector<16x256xf32>
    tpu.vector_store %arg3[%c0_10, %c0_11], %30 {strides = array<i32>} : memref<16x256xf32, #tpu.memory_space<vmem>>, vector<16x256xf32>,
    return
  }
  func.func @transform_0(%arg0: i32) -> (i32, i32) {
    %c0_i32 = arith.constant 0 : i32
    %c0_i32_0 = arith.constant 0 : i32
    return %arg0, %c0_i32 : i32, i32
  }
  func.func @transform_1(%arg0: i32) -> (i32, i32) {
    %c0_i32 = arith.constant 0 : i32
    %c0_i32_0 = arith.constant 0 : i32
    %c0_i32_1 = arith.constant 0 : i32
    return %c0_i32, %c0_i32_0 : i32, i32
  }
  func.func @transform_2(%arg0: i32) -> (i32, i32) {
    %c0_i32 = arith.constant 0 : i32
    %c0_i32_0 = arith.constant 0 : i32
    return %arg0, %c0_i32 : i32, i32
  }
}

</mosaic_0001>

<bundles_post_ra>
// kernel: tpu_custom_call.1
= control target key start
LH: loop header
LB: loop body
LE: loop exit
PB: predicated region body
PF: predicated region fallthrough
CT: control target
= control target key end

     0   :  { %7 = vsyncpa [#allocation3], 0  ;;  %s560_s0 = inlined_call_operand.hbm [shape: f32[16,128], index: 0, kind: input, shape index: {}]   ;;  %s561_s1 = inlined_call_operand.hbm [shape: bf16[256,128], index: 1, kind: input, shape index: {}]   ;;  %s562_s2 = inlined_call_operand.hbm [shape: f32[16,256], index: 2, kind: output, shape index: {}]  }
   0x1   :  { %8 = vsyncpa [#allocation6], 0 }
   0x2   :  { %9 = vsyncpa [#allocation4], 0  ;;  %s14_s11 = sshll.u32 %s560_s0, 4  ;;  %s517_s12 = smov [#allocation2]   ;;  %s15_s11 = int_to_ptr.hbm [resolvable:$true] %s14_s11 }
   0x3   :  { %s16_s13 = sshll.u32 %s517_s12, 4  ;;  %s27_s16 = sshll.u32 %s561_s1, 4  ;;  %s17_s13 = int_to_ptr.vmem [resolvable:$true] %s16_s13  ;;  %s28_s16 = int_to_ptr.hbm [resolvable:$true] %s27_s16 }
   0x4   :  { %s518_s17 = smov 128   ;;  %s519_s18 = smov 8  }
   0x5   :  { %22 = dma.hbm_to_vmem [thread:$0]  %s15_s11, 256, %s17_s13, [#allocation3], %s518_s17, %s518_s17, %s519_s18  }
   0x6   :  { %s520_s19 = smov [#allocation5]   ;;  %s521_s21 = smov 64  }
   0x7   :  { %s29_s20 = sshll.u32 %s520_s19, 4  ;;  %s522_s22 = smov 4   ;;  %s30_s20 = int_to_ptr.vmem [resolvable:$true] %s29_s20 }
   0x8   :  { %35 = dma.hbm_to_vmem [thread:$0]  %s28_s16, 2048, %s30_s20, [#allocation6], %s521_s21, %s521_s21, %s522_s22  }
   0x9   :  { %511 = dma.done.wait [#allocation3], 256  }
   0xa   :  { %512 = vsyncadd [#allocation3], 4294967040 }
   0xb   :  { %513 = dma.done.wait [#allocation6], 2048  }
   0xc   :  { %514 = vsyncadd [#allocation6], 4294965248  ;;  %v547_v0 = vld [vmem:[#allocation2] sm:$0xff]  ;;  %v401_v1 = vld [vmem:[#allocation5 + $0x38] sm:$0xff]  ;;  %s523_s0 = smov [#allocation7]   ;;  %s316_s25 = sshll.u32 %s562_s2, 4  ;;  %s317_s25 = int_to_ptr.hbm [resolvable:$true] %s316_s25 }
   0xd   :  { %v46_v2 = vmul.f32 %v547_v0, %v547_v0  ;;  %v409_v3 = vld [vmem:[#allocation5 + $0x78] sm:$0xff]  ;;  %237 = vmatpush.bf16.xpose.msra.mxu0 %v401_v1  ;;  %v400_v5 = vld [vmem:[#allocation5 + $0x30] sm:$0xff]  ;;  %v399_v8 = vld [vmem:[#allocation5 + $0x28] sm:$0xff]  ;;  %s314_s1 = sshll.u32 %s523_s0, 4  ;;  %s524_s26 = smov 256   ;;  %s315_s1 = int_to_ptr.vmem [resolvable:$true] %s314_s1 }
   0xe   :  { %251 = vmatpush.bf16.xpose.msra.mxu1 %v409_v3  ;;  %v551_v4 = vld [vmem:[#allocation2 + $0x8] sm:$0xff]  ;;  %v408_v7 = vld [vmem:[#allocation5 + $0x70] sm:$0xff]  ;;  %v407_v9 = vld [vmem:[#allocation5 + $0x68] sm:$0xff]  ;;  %s525_s27 = smov 16  }
   0xf   :  { %48 = vadd.xlane.f32.xlu0 %v46_v2  ;;  %v47_v6 = vmul.f32 %v551_v4, %v551_v4  ;;  %v398_v10 = vld [vmem:[#allocation5 + $0x20] sm:$0xff]  ;;  %v397_v12 = vld [vmem:[#allocation5 + $0x18] sm:$0xff]  ;;  %v396_v14 = vld [vmem:[#allocation5 + $0x10] sm:$0xff] }
  0x10   :  { %v406_v11 = vld [vmem:[#allocation5 + $0x60] sm:$0xff]  ;;  %v405_v13 = vld [vmem:[#allocation5 + $0x58] sm:$0xff]  ;;  %v404_v15 = vld [vmem:[#allocation5 + $0x50] sm:$0xff] }
  0x11   :  { %v395_v17 = vld [vmem:[#allocation5 + $0x8] sm:$0xff]  ;;  %v394_v23 = vld [vmem:[#allocation5] sm:$0xff] }
  0x12   :  { %v403_v18 = vld [vmem:[#allocation5 + $0x48] sm:$0xff]  ;;  %v402_v24 = vld [vmem:[#allocation5 + $0x40] sm:$0xff] }
  0x15   :  { %238 = vmatpush.bf16.xpose.msra.mxu0 %v400_v5 }
  0x16   :  { %252 = vmatpush.bf16.xpose.msra.mxu1 %v408_v7 }
  0x17   :  { %50 = vadd.xlane.f32.xlu0 %v47_v6 }
  0x1d   :  { %239 = vmatpush.bf16.xpose.msra.mxu0 %v399_v8 }
  0x1e   :  { %253 = vmatpush.bf16.xpose.msra.mxu1 %v407_v9 }
  0x25   :  { %240 = vmatpush.bf16.xpose.msra.mxu0 %v398_v10 }
  0x26   :  { %254 = vmatpush.bf16.xpose.msra.mxu1 %v406_v11  ;;  %v283_v11 = vlaneseq }
  0x2d   :  { %241 = vmatpush.bf16.xpose.msra.mxu0 %v397_v12 }
  0x2e   :  { %255 = vmatpush.bf16.xpose.msra.mxu1 %v405_v13 }
  0x35   :  { %242 = vmatpush.bf16.xpose.msra.mxu0 %v396_v14 }
  0x36   :  { %256 = vmatpush.bf16.xpose.msra.mxu1 %v404_v15  ;;  %v284_v15 = vand.u32 127, %v283_v11 }
  0x3d   :  { %243 = vmatpush.bf16.xpose.msra.mxu0 %v395_v17 }
  0x3e   :  { %257 = vmatpush.bf16.xpose.msra.mxu1 %v403_v18 }
  0x45   :  { %244 = vmatpush.bf16.xpose.msra.mxu0 %v394_v23 }
  0x46   :  { %258 = vmatpush.bf16.xpose.msra.mxu1 %v402_v24 }
  0x82   :  { %v49_v16 = vpop.xlane.xlu0 %48 }
  0x83   :  { %419 = vrsqrt.f32 %v49_v16  ;;  %vm59_vm0 = vcmp.eq.f32.partialorder %v49_v16, inf  ;;  %v62_v32 = vand.u32 2147483648, %v49_v16  ;;  %vm61_vm1 = vcmp.eq.f32.partialorder %v49_v16, 0.0 }
  0x89   :  { %v420_v19 = vpop.eup %419 }
  0x8a   :  { %v53_v20 = vmul.f32 %v420_v19, %v49_v16  ;;  %v51_v21 = vpop.xlane.xlu0 %50 }
  0x8b   :  { %421 = vrsqrt.f32 %v51_v21  ;;  %vm71_vm2 = vcmp.eq.f32.partialorder %v51_v21, inf  ;;  %v74_v40 = vand.u32 2147483648, %v51_v21  ;;  %vm73_vm3 = vcmp.eq.f32.partialorder %v51_v21, 0.0 }
  0x8c   :  { %v54_v22 = vmul.f32 %v420_v19, %v53_v20 }
  0x8e   :  { %v55_v25 = vmul.f32 0.5, %v54_v22 }
  0x90   :  { %v56_v26 = vsub.f32 1.5, %v55_v25 }
  0x91   :  { %v422_v27 = vpop.eup %421 }
  0x92   :  { %v57_v28 = vmul.f32 %v420_v19, %v56_v26  ;;  %v65_v29 = vmul.f32 %v422_v27, %v51_v21 }
  0x94   :  { %v58_v30 = vmul.f32 %v57_v28, %v49_v16  ;;  %v66_v31 = vmul.f32 %v422_v27, %v65_v29 }
  0x96   :  { %v60_v33 = vsel %vm59_vm0, %v49_v16, %v58_v30  ;;  %v67_v34 = vmul.f32 0.5, %v66_v31 }
  0x97   :  { %v63_v35 = vsel %vm61_vm1, %v62_v32, %v60_v33 }
  0x98   :  { %v76_v36 = vmax.f32 %v63_v35, 1e-12  ;;  %v68_v37 = vsub.f32 1.5, %v67_v34 }
  0x9a   :  { %423 = vrcp.f32 %v76_v36  ;;  %v69_v38 = vmul.f32 %v422_v27, %v68_v37  ;;  %v89_v51 = vand.u32 2147483648, %v76_v36  ;;  %vm83_vm5 = vweird.f32 %v76_v36 }
  0x9b   :  { %v87_v52 = vand.u32 2147483647, %v76_v36 }
  0x9c   :  { %v70_v39 = vmul.f32 %v69_v38, %v51_v21  ;;  %v90_v58 = vor.u32 1.1754944e-38, %v89_v51 }
  0x9d   :  { %vm88_vm8 = vcmp.eq.f32.partialorder %v87_v52, 8.507059e+37 }
  0x9e   :  { %v72_v41 = vsel %vm71_vm2, %v51_v21, %v70_v39 }
  0x9f   :  { %v75_v42 = vsel %vm73_vm3, %v74_v40, %v72_v41 }
  0xa0   :  { %v424_v43 = vpop.eup %423  ;;  %v77_v44 = vmax.f32 %v75_v42, 1e-12 }
  0xa1   :  { %v79_v45 = vmul.f32 %v424_v43, %v76_v36  ;;  %vm84_vm4 = vweird.f32 %v424_v43 }
  0xa2   :  { %425 = vrcp.f32 %v77_v44  ;;  %vm85_vm6 = vmor %vm83_vm5, %vm84_vm4  ;;  %v104_v54 = vand.u32 2147483648, %v77_v44  ;;  %v102_v57 = vand.u32 2147483647, %v77_v44  ;;  %vm98_vm9 = vweird.f32 %v77_v44 }
  0xa3   :  { %v80_v46 = vsub.f32 1.0, %v79_v45 }
  0xa4   :  { %v105_v61 = vor.u32 1.1754944e-38, %v104_v54  ;;  %vm103_vm11 = vcmp.eq.f32.partialorder %v102_v57, 8.507059e+37 }
  0xa5   :  { %v81_v47 = vmul.f32 %v424_v43, %v80_v46 }
  0xa7   :  { %v82_v49 = vadd.f32 %v424_v43, %v81_v47 }
  0xa8   :  { %v426_v48 = vpop.eup %425 }
  0xa9   :  { %v94_v50 = vmul.f32 %v426_v48, %v77_v44  ;;  %v86_v55 = vsel %vm85_vm6, %v424_v43, %v82_v49  ;;  %vm99_vm7 = vweird.f32 %v426_v48 }
  0xaa   :  { %v91_v60 = vsel %vm88_vm8, %v90_v58, %v86_v55  ;;  %vm100_vm10 = vmor %vm98_vm9, %vm99_vm7 }
  0xab   :  { %v95_v53 = vsub.f32 1.0, %v94_v50  ;;  %v92_v1 = vmul.f32 %v91_v60, %v547_v0 }
  0xad   :  { %v96_v56 = vmul.f32 %v426_v48, %v95_v53 }
  0xaf   :  { %v97_v59 = vadd.f32 %v426_v48, %v96_v56 }
  0xb1   :  { %v101_v62 = vsel %vm100_vm10, %v426_v48, %v97_v59 }
  0xb2   :  { %v106_v63 = vsel %vm103_vm11, %v105_v61, %v101_v62 }
  0xb3   :  { %v107_v2 = vmul.f32 %v106_v63, %v551_v4  ;;  %v285_v4 = vadd.s32 128, %v284_v15 }
  0xb5   :  { %v108_v3 = vpack.c.bf16 %v107_v2, %v92_v1  ;;  %vm287_vm12 = vcmp.lt.s32.totalorder %v285_v4, 200 }
  0xb7   :  { %245 = vmatmul.bf16.vlgmr.msra.gmra.mxu0 %v108_v3  ;;  %259 = vmatmul.bf16.vlgmr.msra.gmra.mxu1 %v108_v3 }
 0x134   :  { %v246_v5 = vpop.f32.mrf.mxu0  ;;  %v260_v6 = vpop.f32.mrf.mxu1 }
 0x135   :  { %v265_v7 = vmax.f32 %v246_v5, %v260_v6 }
 0x137   :  { %266 = vmax.xlane.f32.xlu1 %v265_v7 }
 0x13c   :  { %v248_v8 = vpop.f32.mrf.mxu0  ;;  %v262_v9 = vpop.f32.mrf.mxu1 }
 0x13d   :  { %v268_v10 = vmax.f32 %v248_v8, %v262_v9 }
 0x13f   :  { %269 = vmax.xlane.f32.xlu1 %v268_v10 }
 0x1aa   :  { %v267_v12 = vpop.xlane.xlu1 %266 }
 0x1ab   :  { %v271_v13 = vsub.f32 %v246_v5, %v267_v12  ;;  %v272_v14 = vsub.f32 %v260_v6, %v267_v12 }
 0x1ad   :  { %v275_v16 = vmul.f32 1.442695, %v271_v13  ;;  %v277_v0 = vmul.f32 1.442695, %v272_v14 }
 0x1af   :  { %427 = vpow2.f32 %v275_v16 }
 0x1b0   :  { %429 = vpow2.f32 %v277_v0 }
 0x1b2   :  { %v270_v17 = vpop.xlane.xlu1 %269 }
 0x1b3   :  { %v273_v18 = vsub.f32 %v248_v8, %v270_v17  ;;  %v274_v19 = vsub.f32 %v262_v9, %v270_v17 }
 0x1b5   :  { %v428_v20 = vpop.eup %427  ;;  %v279_v21 = vmul.f32 1.442695, %v273_v18  ;;  %v281_v22 = vmul.f32 1.442695, %v274_v19 }
 0x1b6   :  { %v430_v23 = vpop.eup %429 }
 0x1b7   :  { %431 = vpow2.f32 %v279_v21  ;;  %v289_v24 = vsel %vm287_vm12, %v430_v23, 0.0 }
 0x1b8   :  { %433 = vpow2.f32 %v281_v22  ;;  %v292_v25 = vadd.f32 %v428_v20, %v289_v24 }
 0x1ba   :  { %293 = vadd.xlane.f32.xlu2 %v292_v25 }
 0x1bd   :  { %v432_v26 = vpop.eup %431 }
 0x1be   :  { %v434_v27 = vpop.eup %433 }
 0x1bf   :  { %v291_v28 = vsel %vm287_vm12, %v434_v27, 0.0 }
 0x1c0   :  { %v295_v29 = vadd.f32 %v432_v26, %v291_v28 }
 0x1c2   :  { %296 = vadd.xlane.f32.xlu2 %v295_v29 }
 0x22d   :  { %v294_v30 = vpop.xlane.xlu2 %293 }
 0x22e   :  { %v298_v31 = vmax.f32 %v294_v30, 1e-12 }
 0x230   :  { %435 = vrcp.f32 %v298_v31 }
 0x235   :  { %v297_v32 = vpop.xlane.xlu2 %296 }
 0x236   :  { %v436_v33 = vpop.eup %435  ;;  %v299_v34 = vmax.f32 %v297_v32, 1e-12 }
 0x237   :  { %v302_v35 = vmul.f32 %v436_v33, %v428_v20  ;;  %v303_v36 = vmul.f32 %v436_v33, %v289_v24 }
 0x238   :  { %437 = vrcp.f32 %v299_v34 }
 0x239   :  { %306 = vst [vmem:[#allocation7] sm:$0xff] %v302_v35 }
 0x23a   :  { %307 = vst [vmem:[#allocation7 + $0x8] sm:$0xff] %v303_v36 }
 0x23e   :  { %v438_v37 = vpop.eup %437 }
 0x23f   :  { %v304_v38 = vmul.f32 %v438_v37, %v432_v26  ;;  %v305_v39 = vmul.f32 %v438_v37, %v291_v28 }
 0x241   :  { %308 = vst [vmem:[#allocation7 + $0x10] sm:$0xff] %v304_v38 }
 0x242   :  { %309 = vst [vmem:[#allocation7 + $0x18] sm:$0xff] %v305_v39 }
 0x243   :  { %322 = dma.vmem_to_hbm [thread:$0]  %s315_s1, 512, %s317_s25, [#allocation4], %s524_s26, %s524_s26, %s525_s27  }
 0x244   :  { %515 = dma.done.wait [#allocation4], 512  }
 0x245   :  { %516 = vsyncadd [#allocation4], 4294966784 }
 0x246   :  { %327 = vsyncpa [#allocation3], 1 }
 0x247   :  { %328 = vsyncpa [#allocation6], 1 }
 0x248   :  { %329 = vsyncpa [#allocation4], 1 }

</bundles_post_ra>
